<compile_context>
chip_gen: v5e
topology: v5e:2x2
jax: 0.10.0
libtpu: 0.0.40
codegen_flags: <defaults>
</compile_context>

<pallas_src>
import jax
import jax.numpy as jnp
from jax import lax
from jax.experimental import pallas as pl
from jax.experimental.pallas import tpu as pltpu

_EPS = 1e-12            # F.normalize default eps
_EPS_SQ = _EPS * _EPS   # clamp on the squared norm (identical semantics)


def _round_up(x, m):
    return ((x + m - 1) // m) * m


def _scalar_f32(v):
    return jnp.asarray(v, jnp.float32).reshape(-1)[0]


def _make_kernel(batch, tb, nbs):
    """Kernel over (split, tile) grid; pred/targ blocks are (D, tb) lane-dense."""

    def kernel(pred_ref, targ_ref, out_ref, acc_ref):
        c = pl.program_id(0)   # split (TensorCore) index
        i = pl.program_id(1)   # tile index within the split

        @pl.when(i == 0)
        def _init():
            acc_ref[...] = jnp.zeros_like(acc_ref)

        pred = pred_ref[...].astype(jnp.float32)   # (D, tb)
        targ = targ_ref[...].astype(jnp.float32)

        # ---- translation: per-sample || t_x - p_x ||_2 (sublane rows 0:3) ----
        dt = targ[0:3, :] - pred[0:3, :]
        norm_x = jnp.sqrt(jnp.sum(dt * dt, axis=0, keepdims=True))      # (1, tb)

        # ---- rotation: || normalize(t_q) - normalize(p_q) ||_2, expanded ----
        pq = pred[3:, :]
        tq = targ[3:, :]
        pp = jnp.sum(pq * pq, axis=0, keepdims=True)                    # (1, tb)
        tt = jnp.sum(tq * tq, axis=0, keepdims=True)
        pt = jnp.sum(pq * tq, axis=0, keepdims=True)
        rp = lax.rsqrt(jnp.maximum(pp, _EPS_SQ))   # 1 / max(||pq||, eps)
        rt = lax.rsqrt(jnp.maximum(tt, _EPS_SQ))
        dq_sq = pp * (rp * rp) + tt * (rt * rt) - 2.0 * (pt * (rp * rt))
        norm_q = jnp.sqrt(jnp.maximum(dq_sq, 0.0))                      # (1, tb)

        # ---- mask the ragged batch tail (and any fully-overflow tile) ----
        start = (c * nbs + i) * tb
        lane = lax.broadcasted_iota(jnp.int32, (1, tb), 1)
        valid = (start + lane) < batch
        stacked = jnp.concatenate(
            [jnp.where(valid, norm_x, 0.0), jnp.where(valid, norm_q, 0.0)],
            axis=0)                                                     # (2, tb)
        acc_ref[...] += stacked

        @pl.when(i == nbs - 1)
        def _finalize():
            # (2, 1) partial sums broadcast over a lane-dense (2, 128) block.
            sums = jnp.sum(acc_ref[...], axis=1, keepdims=True)
            out_ref[...] = jnp.broadcast_to(sums, (2, 128))

    return kernel


def ca_loc_criterion(pred, targ, sax, saq, *, block_b=65536,
                     min_pallas_batch=4096):
    """Pallas-backed CALocCriterion forward.

    pred, targ: (B, D >= 4) float arrays (f32 or bf16; math is done in f32).
    sax, saq:   shape-(1,) (or scalar) float parameters.
    block_b:    batch tile size in samples (rounded to a multiple of 128).
    """
    assert pred.shape == targ.shape and pred.ndim == 2 and pred.shape[1] >= 4
    B, D = pred.shape

    if B < min_pallas_batch:
        # Launch / relayout overhead dwarfs the useful HBM traffic here.
        return _reference(pred, targ, sax, saq)

    # Lane-dense layout: feature dim (D=7) on sublanes, batch on lanes.
    # TODO(synk): in production emit pred/targ as (D, B) from the producer (or
    # fuse this epilogue into it) to avoid this extra relayout HBM pass.
    pred_t = jnp.transpose(pred)          # (D, B)
    targ_t = jnp.transpose(targ)

    tb = max(128, min(_round_up(block_b, 128), _round_up(B, 128)))
    nb = (B + tb - 1) // tb               # number of batch tiles
    ns = 2 if nb >= 2 else 1              # splits -> v7x 2-TensorCore megacore
    nbs = (nb + ns - 1) // ns             # tiles per split
    n_buf = 3 if nbs >= 3 else 2          # deeper pipelining for long streams

    itemsize = jnp.dtype(pred.dtype).itemsize
    vmem_bytes = int(2 * n_buf * 8 * tb * itemsize   # buffered (D->8, tb) inputs
                     + 8 * tb * 4                    # (2, tb) accumulator (padded)
                     + (4 << 20))                    # headroom
    vmem_bytes = min(max(vmem_bytes, 16 << 20), 48 << 20)

    def in_map(c, i):
        # Clamp the (at most one) overflow tile of the last split onto the final
        # real tile; its lanes are fully masked out in-kernel.
        return (0, jnp.minimum(c * nbs + i, nb - 1))

    kernel = _make_kernel(B, tb, nbs)

    cost = pl.CostEstimate(
        flops=int(45 * B),
        transcendentals=int(4 * B),
        bytes_accessed=int(2 * B * D * itemsize + ns * 2 * 128 * 4),
    )

    parts = pl.pallas_call(
        kernel,
        out_shape=jax.ShapeDtypeStruct((ns, 2, 128), jnp.float32),
        grid=(ns, nbs),
        in_specs=[
            pl.BlockSpec((D, tb), in_map, pipeline_mode=pl.Buffered(n_buf)),
            pl.BlockSpec((D, tb), in_map, pipeline_mode=pl.Buffered(n_buf)),
        ],
        out_specs=pl.BlockSpec((None, 2, 128), lambda c, i: (c, 0, 0)),
        scratch_shapes=[pltpu.VMEM((2, tb), jnp.float32)],
        compiler_params=pltpu.CompilerParams(
            dimension_semantics=("parallel", "arbitrary"),
            vmem_limit_bytes=vmem_bytes),
        cost_estimate=cost,
    )(pred_t, targ_t)

    # Combine per-split partials + scale / beta terms (a few scalar XLA ops).
    sums = jnp.sum(parts[:, :, 0], axis=0)           # (2,): [sum_x, sum_q]
    l_x = sums[0] / B
    l_q = sums[1] / B
    sax_s = _scalar_f32(sax)
    saq_s = _scalar_f32(saq)
    return l_x * jnp.exp(-sax_s) + sax_s + l_q * jnp.exp(-saq_s) + saq_s


def _reference(pred, targ, sax, saq):
    """Pure-JAX reference mirroring the PyTorch forward."""
    pred = pred.astype(jnp.float32)
    targ = targ.astype(jnp.float32)
    l_x = jnp.mean(jnp.linalg.norm(targ[:, 0:3] - pred[:, 0:3], axis=1))

    def norml2(x):
        return x / jnp.maximum(jnp.linalg.norm(x, axis=1, keepdims=True), _EPS)

    l_q = jnp.mean(
        jnp.linalg.norm(norml2(targ[:, 3:]) - norml2(pred[:, 3:]), axis=1))
    sax_s = _scalar_f32(sax)
    saq_s = _scalar_f32(saq)
    return l_x * jnp.exp(-sax_s) + sax_s + l_q * jnp.exp(-saq_s) + saq_s


if __name__ == "__main__":
    key = jax.random.PRNGKey(0)
    k1, k2, k3, k4 = jax.random.split(key, 4)

    # Deterministic parameter init, as in the module's __init__.
    sax = jnp.array([0.0], dtype=jnp.float32)
    saq = jnp.array([-3.0], dtype=jnp.float32)

    # Case 1: B=300, D=7 (3 translation + 4 quaternion), tb=128 -> 3 tiles,
    # 2 splits (incl. one clamped overflow tile) + ragged-tail masking.
    B, D = 300, 7
    pred = jax.random.normal(k1, (B, D), dtype=jnp.float32)
    targ = jax.random.normal(k2, (B, D), dtype=jnp.float32)
    out = jax.block_until_ready(
        ca_loc_criterion(pred, targ, sax, saq, block_b=128, min_pallas_batch=0))
    ref = jax.block_until_ready(_reference(pred, targ, sax, saq))
    assert jnp.allclose(out, ref, rtol=1e-4, atol=1e-5), (out, ref)

    # Case 2: B=1000 -> 8 tiles, 2 splits x 4 tiles, Buffered(3) pipelining.
    B2 = 1000
    pred2 = jax.random.normal(k3, (B2, D), dtype=jnp.float32)
    targ2 = jax.random.normal(k4, (B2, D), dtype=jnp.float32)
    out2 = jax.block_until_ready(
        ca_loc_criterion(pred2, targ2, sax, saq, block_b=128, min_pallas_batch=0))
    ref2 = jax.block_until_ready(_reference(pred2, targ2, sax, saq))
    assert jnp.allclose(out2, ref2, rtol=1e-4, atol=1e-5), (out2, ref2)

    # Case 3: bf16 inputs (half the HBM bytes); kernel upcasts to f32 in-VMEM.
    pred_bf = pred2.astype(jnp.bfloat16)
    targ_bf = targ2.astype(jnp.bfloat16)
    out3 = jax.block_until_ready(
        ca_loc_criterion(pred_bf, targ_bf, sax, saq, block_b=128,
                         min_pallas_batch=0))
    ref3 = jax.block_until_ready(_reference(pred_bf, targ_bf, sax, saq))
    assert jnp.allclose(out3, ref3, rtol=1e-3, atol=1e-3), (out3, ref3)

    print("KERNEL_OK")
</pallas_src>

<mosaic_0001>
module attributes {stable_mosaic.version = 11 : i64} {
  func.func @kernel(%arg0: i32, %arg1: i32, %arg2: memref<7x128xf32, #tpu.memory_space<vmem>>, %arg3: memref<7x128xf32, #tpu.memory_space<vmem>>, %arg4: memref<1x2x128xf32, #tpu.memory_space<vmem>>, %arg5: memref<2x128xf32, #tpu.memory_space<vmem>>) attributes {dimension_semantics = [#tpu.dimension_semantics<parallel>, #tpu.dimension_semantics<arbitrary>], iteration_bounds = array<i64: 2, 2>, scalar_prefetch = 0 : i64, scratch_operands = 1 : i64, tpu.core_type = #tpu.core_type<tc>, window_params = [{pipeline_mode = #tpu.pipeline_mode<double_buffered>, transform_indices = @transform_0, window_bounds = array<i64: 7, 128>}, {pipeline_mode = #tpu.pipeline_mode<double_buffered>, transform_indices = @transform_1, window_bounds = array<i64: 7, 128>}, {transform_indices = @transform_2, window_bounds = array<i64: 1, 2, 128>}]} {
    %c0_i32 = arith.constant 0 : i32
    %0 = arith.cmpi eq, %arg1, %c0_i32 : i32
    %1 = arith.extui %0 : i1 to i32
    %c0_i32_0 = arith.constant 0 : i32
    %2 = arith.cmpi ne, %1, %c0_i32_0 : i32
    scf.if %2 {
      %cst_18 = arith.constant 0.000000e+00 : f32
      %61 = vector.broadcast %cst_18 : f32 to vector<2x128xf32>
      %c0_19 = arith.constant 0 : index
      %c0_20 = arith.constant 0 : index
      %62 = vector.load %arg5[%c0_19, %c0_20] : memref<2x128xf32, #tpu.memory_space<vmem>>, vector<2x128xf32>
      tpu.vector_store %arg5[%c0_19, %c0_20], %61 {strides = array<i32>} : memref<2x128xf32, #tpu.memory_space<vmem>>, vector<2x128xf32>,
    } else {
    }
    %c0 = arith.constant 0 : index
    %c0_1 = arith.constant 0 : index
    %3 = vector.load %arg2[%c0, %c0_1] : memref<7x128xf32, #tpu.memory_space<vmem>>, vector<7x128xf32>
    %c0_2 = arith.constant 0 : index
    %c0_3 = arith.constant 0 : index
    %4 = vector.load %arg3[%c0_2, %c0_3] : memref<7x128xf32, #tpu.memory_space<vmem>>, vector<7x128xf32>
    %5 = vector.extract_strided_slice %4 {offsets = [0, 0], sizes = [3, 128], strides = [1, 1]} : vector<7x128xf32> to vector<3x128xf32>
    %6 = vector.extract_strided_slice %3 {offsets = [0, 0], sizes = [3, 128], strides = [1, 1]} : vector<7x128xf32> to vector<3x128xf32>
    %7 = arith.subf %5, %6 : vector<3x128xf32>
    %8 = arith.mulf %7, %7 : vector<3x128xf32>
    %cst = arith.constant dense<0.000000e+00> : vector<128xf32>
    %9 = vector.multi_reduction <add>, %8, %cst [0] : vector<3x128xf32> to vector<128xf32>
    %10 = vector.shape_cast %9 : vector<128xf32> to vector<1x128xf32>
    %11 = math.sqrt %10 : vector<1x128xf32>
    %12 = vector.extract_strided_slice %3 {offsets = [3, 0], sizes = [4, 128], strides = [1, 1]} : vector<7x128xf32> to vector<4x128xf32>
    %13 = vector.extract_strided_slice %4 {offsets = [3, 0], sizes = [4, 128], strides = [1, 1]} : vector<7x128xf32> to vector<4x128xf32>
    %14 = arith.mulf %12, %12 : vector<4x128xf32>
    %cst_4 = arith.constant dense<0.000000e+00> : vector<128xf32>
    %15 = vector.multi_reduction <add>, %14, %cst_4 [0] : vector<4x128xf32> to vector<128xf32>
    %16 = vector.shape_cast %15 : vector<128xf32> to vector<1x128xf32>
    %17 = arith.mulf %13, %13 : vector<4x128xf32>
    %cst_5 = arith.constant dense<0.000000e+00> : vector<128xf32>
    %18 = vector.multi_reduction <add>, %17, %cst_5 [0] : vector<4x128xf32> to vector<128xf32>
    %19 = vector.shape_cast %18 : vector<128xf32> to vector<1x128xf32>
    %20 = arith.mulf %12, %13 : vector<4x128xf32>
    %cst_6 = arith.constant dense<0.000000e+00> : vector<128xf32>
    %21 = vector.multi_reduction <add>, %20, %cst_6 [0] : vector<4x128xf32> to vector<128xf32>
    %22 = vector.shape_cast %21 : vector<128xf32> to vector<1x128xf32>
    %cst_7 = arith.constant 1.000000e-24 : f32
    %23 = vector.broadcast %cst_7 : f32 to vector<1x128xf32>
    %24 = arith.maximumf %16, %23 : vector<1x128xf32>
    %25 = math.rsqrt %24 : vector<1x128xf32>
    %cst_8 = arith.constant 1.000000e-24 : f32
    %26 = vector.broadcast %cst_8 : f32 to vector<1x128xf32>
    %27 = arith.maximumf %19, %26 : vector<1x128xf32>
    %28 = math.rsqrt %27 : vector<1x128xf32>
    %29 = arith.mulf %25, %25 : vector<1x128xf32>
    %30 = arith.mulf %16, %29 : vector<1x128xf32>
    %31 = arith.mulf %28, %28 : vector<1x128xf32>
    %32 = arith.mulf %19, %31 : vector<1x128xf32>
    %33 = arith.addf %30, %32 : vector<1x128xf32>
    %34 = arith.mulf %25, %28 : vector<1x128xf32>
    %35 = arith.mulf %22, %34 : vector<1x128xf32>
    %cst_9 = arith.constant 2.000000e+00 : f32
    %36 = vector.broadcast %cst_9 : f32 to vector<1x128xf32>
    %37 = arith.mulf %36, %35 : vector<1x128xf32>
    %38 = arith.subf %33, %37 : vector<1x128xf32>
    %cst_10 = arith.constant 0.000000e+00 : f32
    %39 = vector.broadcast %cst_10 : f32 to vector<1x128xf32>
    %40 = arith.maximumf %38, %39 : vector<1x128xf32>
    %41 = math.sqrt %40 : vector<1x128xf32>
    %c2_i32 = arith.constant 2 : i32
    %42 = arith.muli %arg0, %c2_i32 : i32
    %43 = arith.addi %42, %arg1 : i32
    %c128_i32 = arith.constant 128 : i32
    %44 = arith.muli %43, %c128_i32 : i32
    %45 = tpu.iota {dimensions = array<i32: 1>} : vector<1x128xi32>
    %46 = vector.broadcast %44 : i32 to vector<1x128xi32>
    %47 = arith.addi %46, %45 : vector<1x128xi32>
    %c300_i32 = arith.constant 300 : i32
    %48 = vector.broadcast %c300_i32 : i32 to vector<1x128xi32>
    %49 = arith.cmpi slt, %47, %48 : vector<1x128xi32>
    %cst_11 = arith.constant 0.000000e+00 : f32
    %50 = vector.broadcast %cst_11 : f32 to vector<1x128xf32>
    %51 = arith.select %49, %11, %50 : vector<1x128xi1>, vector<1x128xf32>
    %cst_12 = arith.constant 0.000000e+00 : f32
    %52 = vector.broadcast %cst_12 : f32 to vector<1x128xf32>
    %53 = arith.select %49, %41, %52 : vector<1x128xi1>, vector<1x128xf32>
    %54 = tpu.concatenate %51, %53 in 0 : vector<1x128xf32>, vector<1x128xf32> -> vector<2x128xf32>
    %c0_13 = arith.constant 0 : index
    %c0_14 = arith.constant 0 : index
    %55 = vector.load %arg5[%c0_13, %c0_14] : memref<2x128xf32, #tpu.memory_space<vmem>>, vector<2x128xf32>
    %56 = arith.addf %55, %54 : vector<2x128xf32>
    %c0_15 = arith.constant 0 : index
    %c0_16 = arith.constant 0 : index
    %57 = vector.load %arg5[%c0_15, %c0_16] : memref<2x128xf32, #tpu.memory_space<vmem>>, vector<2x128xf32>
    tpu.vector_store %arg5[%c0_15, %c0_16], %56 {strides = array<i32>} : memref<2x128xf32, #tpu.memory_space<vmem>>, vector<2x128xf32>,
    %c1_i32 = arith.constant 1 : i32
    %58 = arith.cmpi eq, %arg1, %c1_i32 : i32
    %59 = arith.extui %58 : i1 to i32
    %c0_i32_17 = arith.constant 0 : i32
    %60 = arith.cmpi ne, %59, %c0_i32_17 : i32
    scf.if %60 {
      %c0_18 = arith.constant 0 : index
      %c0_19 = arith.constant 0 : index
      %61 = vector.load %arg5[%c0_18, %c0_19] : memref<2x128xf32, #tpu.memory_space<vmem>>, vector<2x128xf32>
      %cst_20 = arith.constant dense<0.000000e+00> : vector<2xf32>
      %62 = vector.multi_reduction <add>, %61, %cst_20 [1] : vector<2x128xf32> to vector<2xf32>
      %63 = vector.shape_cast %62 : vector<2xf32> to vector<2x1xf32>
      %64 = vector.shape_cast %63 : vector<2x1xf32> to vector<2x1xf32>
      %65 = vector.broadcast %64 : vector<2x1xf32> to vector<2x128xf32>
      %c0_21 = arith.constant 0 : index
      %c0_22 = arith.constant 0 : index
      %c0_23 = arith.constant 0 : index
      %66 = vector.load %arg4[%c0_21, %c0_22, %c0_23] : memref<1x2x128xf32, #tpu.memory_space<vmem>>, vector<1x2x128xf32>
      %67 = vector.shape_cast %66 : vector<1x2x128xf32> to vector<2x128xf32>
      %68 = vector.shape_cast %65 : vector<2x128xf32> to vector<1x2x128xf32>
      tpu.vector_store %arg4[%c0_21, %c0_22, %c0_23], %68 {strides = array<i32>} : memref<1x2x128xf32, #tpu.memory_space<vmem>>, vector<1x2x128xf32>,
    } else {
    }
    return
  }
  func.func @transform_0(%arg0: i32, %arg1: i32) -> (i32, i32) {
    %c2_i32 = arith.constant 2 : i32
    %0 = arith.muli %arg0, %c2_i32 : i32
    %1 = arith.addi %0, %arg1 : i32
    %c2_i32_0 = arith.constant 2 : i32
    %2 = arith.minsi %1, %c2_i32_0 : i32
    %c0_i32 = arith.constant 0 : i32
    %c0_i32_1 = arith.constant 0 : i32
    return %c0_i32, %2 : i32, i32
  }
  func.func @transform_1(%arg0: i32, %arg1: i32) -> (i32, i32) {
    %c2_i32 = arith.constant 2 : i32
    %0 = arith.muli %arg0, %c2_i32 : i32
    %1 = arith.addi %0, %arg1 : i32
    %c2_i32_0 = arith.constant 2 : i32
    %2 = arith.minsi %1, %c2_i32_0 : i32
    %c0_i32 = arith.constant 0 : i32
    %c0_i32_1 = arith.constant 0 : i32
    return %c0_i32, %2 : i32, i32
  }
  func.func @transform_2(%arg0: i32, %arg1: i32) -> (i32, i32, i32) {
    %c0_i32 = arith.constant 0 : i32
    %c0_i32_0 = arith.constant 0 : i32
    %c0_i32_1 = arith.constant 0 : i32
    return %arg0, %c0_i32, %c0_i32_0 : i32, i32, i32
  }
}

</mosaic_0001>

<bundles_post_ra>
// kernel: tpu_custom_call.1
= control target key start
LH: loop header
LB: loop body
LE: loop exit
PB: predicated region body
PF: predicated region fallthrough
CT: control target
= control target key end

     0   :  { %s1058_s0 = inlined_call_operand.hbm [shape: f32[7,300], index: 0, kind: input, shape index: {}]   ;;  %s1059_s1 = inlined_call_operand.hbm [shape: f32[7,300], index: 1, kind: input, shape index: {}]   ;;  %s1060_s2 = inlined_call_operand.hbm [shape: f32[2,2,128], index: 2, kind: output, shape index: {}]  }
   0x1   :  { %1065 = sst [smem:[#allocation17_spill]] %s1058_s0 }
   0x2   :  { %7 = vsyncpa [#allocation4], 0 }
   0x3   :  { %9 = vsyncpa [#allocation4 + $0x1], 0 }
   0x4   :  { %10 = vsyncpa [#allocation7], 0 }
   0x5   :  { %12 = vsyncpa [#allocation7 + $0x1], 0 }
   0x6   :  { %13 = vsyncpa [#allocation5], 0 }
   0x7   :  { %15 = vsyncpa [#allocation5 + $0x1], 0  ;;  %s842_s9 = smov 0   ;;  %s844_s10 = smov 0  }
   0x8   :  { %s846_s11 = smov 0   ;;  %s848_s12 = smov 0  }
   0x9   :  { %s850_s13 = smov 0   ;;  %s852_s14 = smov 0  }
   0xa   :  { %s854_s15 = smov 0   ;;  %s856_s16 = smov 0  }
   0xb   :  { %s858_s17 = smov 0   ;;  %s860_s18 = smov 0  }
   0xc   :  { %s862_s19 = smov 0  }
   0xd LB: > { %1066 = sst [smem:[#allocation12_spill]] %s816_s17  ;;  %s496_s20 = sadd.s32 4294967295, %s824_s19   ;;  %s824_s19 = sphi %s862_s19, %s21_s19   ;;  %s820_s18 = sphi %s860_s18, %s1080_s18   ;;  %s816_s17 = sphi %s858_s17, %s1079_s17   ;;  %s812_s16 = sphi %s856_s16, %s1078_s16   ;;  %s808_s15 = sphi %s854_s15, %s1077_s15   ;;  %s804_s14 = sphi %s852_s14, %s1086_s14   ;;  %s800_s13 = sphi %s850_s13, %s1085_s13   ;;  %s796_s12 = sphi %s848_s12, %s1084_s12   ;;  %s792_s11 = sphi %s846_s11, %s1083_s11   ;;  %s788_s10 = sphi %s844_s10, %s1082_s10   ;;  %s784_s9 = sphi %s842_s9, %s1081_s9  }
   0xe   : > { %1067 = sst [smem:[#allocation13_spill]] %s820_s18  ;;  %s497_s21 = sadd.s32 4294967294, %s824_s19  }
   0xf   : > { %s30_s22 = sadd.s32 1, %s816_s17  ;;  %s33_s23 = sadd.s32 1, %s820_s18 }
  0x10   : > { %p31_p0 = scmp.ge.s32.totalorder %s30_s22, 2  ;;  %s498_s24 = sshll.u32 %s820_s18, 1 }
  0x11   : > { %s38_s25 = sadd.s32 %s816_s17, %s498_s24  ;;  %s48_s26 = sadd.s32 1, %s804_s14 }
  0x12   : > { %s1088_s22 = smov (%p31_p0, %s30_s22), 0  ;;  %s1090_s23 = smov (!%p31_p0, %s33_s23), %s820_s18 }
  0x13   : > { %1068 = sst [smem:[#allocation14_spill]] %s1088_s22  ;;  %p39_p1 = scmp.lt.s32.totalorder %s38_s25, 2 }
  0x14   : > { %p55_p2 = scmp.ne.s32.totalorder %s804_s14, %s800_s13  ;;  %p35_p3 = scmp.ge.s32.totalorder %s1090_s23, 2 }
  0x15   : > { %p56_p4 = scmp.eq.s32.totalorder %s824_s19, 0  ;;  %s1092_s25 = smov (!%p39_p1, %s38_s25), 2 }
  0x16   : > { %s1094_s23 = smov (%p35_p3, %s1090_s23), 0  ;;  %p61_p6 = scmp.ne.s32.totalorder %s800_s13, %s796_s12 }
  0x17   : > { %1069 = sst [smem:[#allocation15_spill]] %s1094_s23  ;;  %p914_p5 = por %p56_p4, %p55_p2 }
  0x18   : > { %s499_s28 = sshll.u32 %s1094_s23, 1  ;;  %p62_p7 = scmp.eq.s32.totalorder %s496_s20, 0 }
  0x19   : > { %s42_s29 = sadd.s32 %s499_s28, %s1088_s22  ;;  %s105_s30 = ssub.s32 %s820_s18, %s1094_s23 }
  0x1a   : > { %p43_p8 = scmp.lt.s32.totalorder %s42_s29, 2  ;;  %p926_p9 = por %p62_p7, %p61_p6 }
  0x1b   : > { %p106_p10 = scmp.eq.s32.totalorder %s105_s30, 0  ;;  %s108_s4 = sadd.s32 1, %s792_s11 }
  0x1c   : > { %s1096_s29 = smov (!%p43_p8, %s42_s29), 2  ;;  %p118_p11 = scmp.ne.s32.totalorder %s792_s11, %s788_s10 }
  0x1d   : > { %s932_s5 = scalar_select %p106_p10, %s792_s11, %s108_s4  }
  0x1e   : > { %s45_s6 = ssub.s32 %s1092_s25, %s1096_s29  ;;  %p119_p13 = scmp.eq.s32.totalorder %s496_s20, 3 }
  0x1f   : > { %p46_p12 = scmp.eq.s32.totalorder %s45_s6, 0  ;;  %p124_p0 = scmp.ne.s32.totalorder %s788_s10, %s784_s9 }
  0x20   : > { %p125_p1 = scmp.eq.s32.totalorder %s497_s21, 3  ;;  %p946_p2 = por %p119_p13, %p118_p11 }
  0x21   : > { %s944_s7 = scalar_select %p46_p12, %s804_s14, %s48_s26  }
  0x22   : > { %p950_p3 = por %p125_p1, %p124_p0  ;;  %p539_p4 = scmp.lt.s32.totalorder %s824_s19, 4 }
  0x23   : > { %1072 = sst [smem:[#allocation16_spill]] %s944_s7  ;;  %s145_s24 = sand.u32 1, %s804_s14  }
  0x24   : > { %s506_s28 = sshll.u32 %s1092_s25, 3  ;;  %s504_s20 = sshll.u32 %s145_s24, 3 }
  0x25   : > { %s1075_s0 = sld [smem:[#allocation17_spill]]  ;;  %s149_s6 = scalar_lea.vmem [#allocation3], %s504_s20 }
  0x26   : > { %s161_s26 = sshll.u32 %s149_s6, 4  ;;  %p529_p6 = pnand %p539_p4, %p914_p5  ;;  %s162_s26 = int_to_ptr.vmem [resolvable:$true] %s161_s26 }
  0x27   : > { %p510_p7 = scmp.ge.s32.totalorder %s824_s19, 1  ;;  %p189_p8 = scmp.lt.s32.totalorder %s824_s19, 5 }
  0x28   : > { %s146_s23 = scalar_lea.sflag [#allocation4], %s145_s24  ;;  %s180_s25 = scalar_lea.hbm %s1059_s1, %s506_s28 }
  0x29   : > { %p190_p10 = pnand %p510_p7, %p189_p8  ;;  %s182_s17 = sshll.u32 %s180_s25, 4  ;;  %s183_s17 = int_to_ptr.hbm [resolvable:$true] %s182_s17 }
  0x2a   : > { %s172_s7 = scalar_lea.vmem [#allocation6], %s504_s20  ;;  %s169_s30 = scalar_lea.sflag [#allocation7], %s145_s24 }
  0x2b   : > { %s157_s4 = scalar_lea.hbm %s1075_s0, %s506_s28  ;;  %s184_s29 = sshll.u32 %s172_s7, 4  ;;  %s185_s29 = int_to_ptr.vmem [resolvable:$true] %s184_s29 }
  0x2c   : > { %s159_s21 = sshll.u32 %s157_s4, 4  ;;  %193 = sbr.rel (%p190_p10) target bundleno = 276 (0x114), region = 28  ;;  %s160_s21 = int_to_ptr.hbm [resolvable:$true] %s159_s21 }
  0x2d   : > { %531 = dma.hbm_to_vmem [thread:$0]  (!%p529_p6), %s160_s21, 128, %s162_s26, %s146_s23  }
  0x2e   : > { %534 = dma.hbm_to_vmem [thread:$0]  (!%p529_p6), %s183_s17, 128, %s185_s29, %s169_s30  }
  0x2f   : > { %s195_s27 = sand.u32 (!%p190_p10), 1, %s800_s13  }
  0x30   : > { %s511_s4 = sshll.u32 (!%p190_p10), %s195_s27, 3  ;;  %s196_s6 = scalar_lea.sflag (!%p190_p10), [#allocation4], %s195_s27 }
  0x31   : > { %s199_s0 = scalar_lea.vmem [#allocation3], %s511_s4 }
  0x32   : > { %771 = dma.done.wait (%p926_p9), %s196_s6, 128  }
  0x33   : > { %773 = vsyncadd (%p926_p9), %s196_s6, 4294967168  ;;  %s206_s18 = scalar_lea.sflag [#allocation7], %s195_s27  ;;  %s209_s22 = scalar_lea.vmem [#allocation6], %s511_s4 }
  0x34   : > { %775 = dma.done.wait (%p926_p9), %s206_s18, 128  }
  0x35   : > { %777 = vsyncadd (%p926_p9), %s206_s18, 4294967168  ;;  %s233_s17 = sand.u32 1, %s788_s10   ;;  %p514_p5 = scmp.ne.s32.totalorder %s808_s15, 0 }
  0x36   : > { %s979_s23 = sshll.u32 %s233_s17, 1 }
  0x37   : > { %s235_s7 = scalar_lea.vmem [#allocation8], %s979_s23  ;;  %247 = sbr.rel (%p514_p5) target bundleno = 62 (0x3e), region = 40 }
  0x3c   : > { %v826_v0 = vmov 0.0  }
  0x3d   : > { %248 = vst [vmem:[#allocation2] sm:$0x3] %v826_v0 }
  0x3e PF: > { %v249_v1 = vld [vmem:[%s199_s0] sm:$0x7f]  ;;  %v250_v2 = vld [vmem:[%s209_s22] sm:$0x7f]  ;;  %vm253_vm0 = vcmask 1042432   ;;  %vm277_vm1 = vcmask 1043456  }
  0x3f   : > { %v251_v3 = vsub.f32 %v250_v2, %v249_v1  ;;  %v273_v4 = vmul.f32 %v249_v1, %v249_v1  ;;  %v285_v5 = vmul.f32 %v250_v2, %v250_v2  ;;  %v296_v15 = vmul.f32 %v250_v2, %v249_v1  ;;  %s515_s0 = sshll.u32 %s812_s16, 1  ;;  %p517_p9 = scmp.ne.s32.totalorder %s808_s15, 1 }
  0x40   : > { %s352_s3 = sadd.s32 %s808_s15, %s515_s0  ;;  %vm361_vm13 = vcmask 1040384  }
  0x41   : > { %v252_v6 = vmul.f32 %v251_v3, %v251_v3  ;;  %v275_v7 = vrot.slane %v273_v4, 3  ;;  %v287_v8 = vrot.slane %v285_v5, 3  ;;  %v298_v21 = vrot.slane %v296_v15, 3  ;;  %s516_s24 = sshll.u32 %s352_s3, 7 }
  0x43   : > { %v254_v9 = vsel %vm253_vm0, %v252_v6, 0.0  ;;  %v278_v10 = vsel %vm277_vm1, %v275_v7, 0.0  ;;  %v289_v11 = vsel %vm277_vm1, %v287_v8, 0.0  ;;  %v300_v27 = vsel %vm277_vm1, %v298_v21, 0.0 }
  0x44   : > { %v255_v12 = vrot.slane %v254_v9, 4  ;;  %v279_v13 = vrot.slane %v278_v10, 4  ;;  %v290_v14 = vrot.slane %v289_v11, 4  ;;  %v301_v31 = vrot.slane %v300_v27, 4 }
  0x45   : > { %v354_v6 = vlaneseq }
  0x46   : > { %v280_v16 = vadd.f32 %v279_v13, %v278_v10  ;;  %v291_v17 = vadd.f32 %v290_v14, %v289_v11  ;;  %v256_v18 = vadd.f32 %v255_v12, %v254_v9  ;;  %v302_v35 = vadd.f32 %v301_v31, %v300_v27 }
  0x47   : > { %v355_v10 = vand.u32 127, %v354_v6  ;;  %v356_v13 = vstv %s516_s24 }
  0x48   : > { %v281_v19 = vrot.slane %v280_v16, 2  ;;  %v292_v20 = vrot.slane %v291_v17, 2  ;;  %v257_v24 = vrot.slane %v256_v18, 2  ;;  %v303_v37 = vrot.slane %v302_v35, 2 }
  0x4a   : > { %v282_v22 = vadd.f32 %v281_v19, %v280_v16  ;;  %v293_v23 = vadd.f32 %v292_v20, %v291_v17  ;;  %v258_v30 = vadd.f32 %v257_v24, %v256_v18  ;;  %v304_v42 = vadd.f32 %v303_v37, %v302_v35 }
  0x4b   : > { %v357_v16 = vadd.s32 %v356_v13, %v355_v10 }
  0x4c   : > { %v283_v25 = vrot.slane %v282_v22, 1  ;;  %v294_v26 = vrot.slane %v293_v23, 1  ;;  %v259_v34 = vrot.slane %v258_v30, 1  ;;  %v305_v47 = vrot.slane %v304_v42, 1 }
  0x4d   : > { %vm358_vm11 = vcmp.lt.s32.totalorder %v357_v16, 300 }
  0x4e   : > { %v284_v28 = vadd.f32 %v283_v25, %v282_v22  ;;  %v295_v29 = vadd.f32 %v294_v26, %v293_v23  ;;  %v986_v36 = vadd.f32 %v259_v34, %v258_v30  ;;  %v306_v53 = vadd.f32 %v305_v47, %v304_v42  ;;  %v363_v26 = vld [vmem:[#allocation2] sm:$0x3] }
  0x50   : > { %v307_v32 = vmax.f32 %v284_v28, 1e-24  ;;  %v318_v33 = vmax.f32 %v295_v29, 1e-24  ;;  %vm268_vm8 = vcmp.eq.f32.partialorder %v986_v36, inf  ;;  %v271_v15 = vand.u32 2147483648, %v986_v36 }
  0x51   : > { %vm270_vm9 = vcmp.eq.f32.partialorder %v986_v36, 0.0 }
  0x52   : > { %630 = vrsqrt.f32 %v307_v32  ;;  %vm314_vm2 = vweird.f32 %v307_v32  ;;  %vm325_vm4 = vweird.f32 %v318_v33 }
  0x53   : > { %632 = vrsqrt.f32 %v318_v33 }
  0x54   : > { %634 = vrsqrt.f32 %v986_v36 }
  0x58   : > { %v631_v38 = vpop.eup %630 }
  0x59   : > { %v633_v39 = vpop.eup %632  ;;  %v309_v40 = vmul.f32 %v631_v38, %v307_v32  ;;  %vm315_vm3 = vweird.f32 %v631_v38 }
  0x5a   : > { %v320_v41 = vmul.f32 %v633_v39, %v318_v33  ;;  %vm326_vm5 = vweird.f32 %v633_v39  ;;  %vm316_vm6 = vmor %vm314_vm2, %vm315_vm3  ;;  %v635_v50 = vpop.eup %634 }
  0x5b   : > { %v310_v43 = vmul.f32 %v631_v38, %v309_v40  ;;  %vm327_vm7 = vmor %vm325_vm4, %vm326_vm5  ;;  %v262_v55 = vmul.f32 %v635_v50, %v986_v36 }
  0x5c   : > { %v321_v44 = vmul.f32 %v633_v39, %v320_v41 }
  0x5d   : > { %v311_v45 = vmul.f32 0.5, %v310_v43  ;;  %v263_v63 = vmul.f32 %v635_v50, %v262_v55 }
  0x5e   : > { %v322_v46 = vmul.f32 0.5, %v321_v44 }
  0x5f   : > { %v312_v48 = vsub.f32 1.5, %v311_v45  ;;  %v264_v3 = vmul.f32 0.5, %v263_v63 }
  0x60   : > { %v323_v49 = vsub.f32 1.5, %v322_v46 }
  0x61   : > { %v313_v51 = vmul.f32 %v631_v38, %v312_v48  ;;  %v265_v5 = vsub.f32 1.5, %v264_v3 }
  0x62   : > { %v324_v52 = vmul.f32 %v633_v39, %v323_v49 }
  0x63   : > { %v317_v54 = vsel %vm316_vm6, %v631_v38, %v313_v51  ;;  %v266_v7 = vmul.f32 %v635_v50, %v265_v5 }
  0x64   : > { %v328_v56 = vsel %vm327_vm7, %v633_v39, %v324_v52  ;;  %v329_v57 = vmul.f32 %v317_v54, %v317_v54 }
  0x65   : > { %v331_v58 = vmul.f32 %v328_v56, %v328_v56  ;;  %v334_v59 = vmul.f32 %v328_v56, %v317_v54  ;;  %v267_v11 = vmul.f32 %v266_v7, %v986_v36 }
  0x66   : > { %v330_v60 = vmul.f32 %v329_v57, %v284_v28 }
  0x67   : > { %v332_v61 = vmul.f32 %v331_v58, %v295_v29  ;;  %v335_v62 = vmul.f32 %v334_v59, %v306_v53  ;;  %v269_v17 = vsel %vm268_vm8, %v986_v36, %v267_v11 }
  0x68   : > { %v272_v20 = vsel %vm270_vm9, %v271_v15, %v269_v17 }
  0x69   : > { %v333_v0 = vadd.f32 %v332_v61, %v330_v60  ;;  %v336_v1 = vmul.f32 2.0, %v335_v62  ;;  %v359_v24 = vsel %vm358_vm11, %v272_v20, 0.0 }
  0x6b   : > { %v337_v2 = vsub.f32 %v333_v0, %v336_v1 }
  0x6d   : > { %v338_v4 = vmax.f32 %v337_v2, 0.0 }
  0x6f   : > { %636 = vrsqrt.f32 %v338_v4  ;;  %vm346_vm10 = vcmp.eq.f32.partialorder %v338_v4, inf  ;;  %v349_v21 = vand.u32 2147483648, %v338_v4  ;;  %vm348_vm12 = vcmp.eq.f32.partialorder %v338_v4, 0.0 }
  0x75   : > { %v637_v8 = vpop.eup %636 }
  0x76   : > { %v340_v9 = vmul.f32 %v637_v8, %v338_v4 }
  0x78   : > { %v341_v12 = vmul.f32 %v637_v8, %v340_v9 }
  0x7a   : > { %v342_v14 = vmul.f32 0.5, %v341_v12 }
  0x7c   : > { %v343_v18 = vsub.f32 1.5, %v342_v14 }
  0x7e   : > { %v344_v19 = vmul.f32 %v637_v8, %v343_v18 }
  0x80   : > { %v345_v22 = vmul.f32 %v344_v19, %v338_v4 }
  0x82   : > { %v347_v23 = vsel %vm346_vm10, %v338_v4, %v345_v22 }
  0x83   : > { %v350_v25 = vsel %vm348_vm12, %v349_v21, %v347_v23 }
  0x84   : > { %v360_v27 = vsel %vm358_vm11, %v350_v25, 0.0  ;;  %369 = sbr.rel (%p517_p9) target bundleno = 262 (0x106), region = 44 }
  0x85   : > { %v362_v28 = vsel %vm361_vm13, %v359_v24, %v360_v27 }
  0x86   : > { %v364_v29 = vadd.f32 %v363_v26, %v362_v28 }
  0x88   : > { %365 = vst [vmem:[#allocation2] sm:$0x3] %v364_v29 }
  0x89   : > { %vm371_vm14 = vcmask 1041408  }
  0x8f   : > { %v370_v30 = vld [vmem:[#allocation2] sm:$0x3] }
  0x90   : > { %v372_v31 = vsel %vm371_vm14, %v370_v30, 0.0 }
  0x91   : > { %373 = vadd.xlane.f32.xlu0 %v372_v31 }
 0x104   : > { %v374_v32 = vpop.xlane.xlu0 %373 }
 0x105   : > { %375 = vst [vmem:[%s235_s7] sm:$0x3] %v374_v32 }
 0x106 PF: > { %s387_s21 = scalar_lea.hbm %s1060_s2, %s515_s0  ;;  %s389_s15 = sshll.u32 %s235_s7, 4  ;;  %s390_s15 = int_to_ptr.vmem [resolvable:$true] %s389_s15 }
 0x107   : > { %s391_s26 = sshll.u32 %s387_s21, 4  ;;  %s377_s25 = scalar_lea.sflag [#allocation5], %s233_s17  ;;  %s392_s26 = int_to_ptr.hbm [resolvable:$true] %s391_s26 }
 0x108   : > { %s712_s29 = sshra.s32 %s392_s26, 4  ;;  %s718_s4 = scalar_lea.hbm %s1060_s2, 4  ;;  %s713_s29 = int_to_ptr.hbm [resolvable:$true] %s712_s29 }
 0x109   : > { %s714_s30 = scalar_lea.hbm %s713_s29, 2  ;;  %p719_p0 = scmp.lt.s32.totalorder %s713_s29, %s1060_s2 }
 0x10a   : > { %p715_p11 = scmp.ne.s32.totalorder %s713_s29, %s714_s30  ;;  %p720_p1 = scmp.lt.s32.totalorder %s718_s4, %s714_s30 }
 0x10c   : > { %p716_p12 = pnand %p715_p11, %p946_p2  ;;  %p721_p4 = por %p720_p1, %p719_p0 }
 0x10e   : > { %p717_p13 = pneg %p716_p12 }
 0x110   : > { %p722_p6 = pnand %p721_p4, %p717_p13 }
 0x112   : > { %725 = shalt.err (!%p722_p6)
}
 0x113   : > { %526 = dma.vmem_to_hbm [thread:$0]  (%p946_p2), %s390_s15, 32, %s392_s26, %s377_s25  }
 0x114 PF: > { %p540_p7 = scmp.ge.s32.totalorder %s824_s19, 2  ;;  %s403_s22 = sand.u32 1, %s784_s9  }
 0x115   : > { %s404_s17 = scalar_lea.sflag [#allocation5], %s403_s22 }
 0x116   : > { %p536_p8 = pnand %p540_p7, %p950_p3 }
 0x118   : > { %p537_p10 = pneg %p536_p8 }
 0x11a   : > { %779 = dma.done.wait (%p537_p10), %s404_s17, 32  }
 0x11b   : > { %781 = vsyncadd (%p537_p10), %s404_s17, 4294967264  ;;  %s21_s19 = sadd.s32 1, %s824_s19   ;;  %s1076_s8 = sld [smem:[#allocation16_spill]] }
 0x11c   : > { %p18_p5 = scmp.ge.s32.totalorder %s21_s19, 6   ;;  %s1077_s15 = sld [smem:[#allocation12_spill]] }
 0x11d   : > { %s1078_s16 = sld [smem:[#allocation13_spill]]  ;;  %s1081_s9 = smov %s788_s10 }
 0x11e   : > { %s1079_s17 = sld [smem:[#allocation14_spill]]  ;;  %s1082_s10 = smov %s792_s11 }
 0x11f   : > { %s1080_s18 = sld [smem:[#allocation15_spill]]  ;;  %s1083_s11 = smov %s932_s5 }
 0x120   : > { %s1084_s12 = smov %s800_s13  ;;  %s1085_s13 = smov %s804_s14 }
 0x121   : > { %s1086_s14 = smov %s1076_s8  ;;  %20 = sbr.rel (!%p18_p5) target bundleno = 13 (0xd), region = 94 }
 0x126   :  { %410 = vsyncpa [#allocation4], 1 }
 0x127   :  { %412 = vsyncpa [#allocation4 + $0x1], 1 }
 0x128   :  { %413 = vsyncpa [#allocation7], 1 }
 0x129   :  { %415 = vsyncpa [#allocation7 + $0x1], 1 }
 0x12a   :  { %416 = vsyncpa [#allocation5], 1 }
 0x12b   :  { %418 = vsyncpa [#allocation5 + $0x1], 1 }

</bundles_post_ra>
